<compile_context>
chip_gen: v7x
topology: tpu7x:2x2x1
jax: 0.10.0
libtpu: 0.0.40
codegen_flags: <defaults>
</compile_context>

<pallas_src>
import jax
import jax.numpy as jnp
from jax.experimental import pallas as pl
from jax.experimental.pallas import tpu as pltpu

BITS_OUT = 4
QMAX = float(2 ** BITS_OUT - 1)   # uint range [0, 2^bits - 1] (symmetric=False for ReLU)

_TARGET_BLOCK_BYTES = 4 << 20     # ~4 MiB input block; in+out double-buffered = 16 MiB
_VMEM_LIMIT_BYTES = 32 << 20      # headroom on v5e (16 MiB scoped default otherwise)


def _choose_lanes(total):
    """Largest lane-dense last dim (multiple of 128) that divides `total` exactly."""
    for lanes in (1024, 512, 256, 128):
        if total % lanes == 0:
            return lanes
    return 128  # rare path: needs a small pad to the next multiple of 128


def _relu_lsq_kernel(scalars_ref, x_ref, o_ref):
    """Fused ReLU + LSQ fake-quantization (elementwise).

    scalars_ref: (2,) f32 scalar-prefetch ref in SMEM: [inv_step, step]
    """
    inv_step = scalars_ref[0]
    step = scalars_ref[1]
    y = jnp.maximum(x_ref[...], 0.0)                      # wrapped nn.ReLU
    q = jnp.clip(jnp.round(y * inv_step), 0.0, QMAX)      # quantize (mul by exact 1/step)
    fq = q * step                                         # dequantize (fake quant)
    # step == 0 means the quantizer is uninitialized/degenerate -> plain relu
    # (PyTorch would surface inf/NaN; zeroing silently would hide an init bug).
    o_ref[...] = jnp.where(step != 0.0, fq, y).astype(o_ref.dtype)


def activation_module_wrapper_forward(x, step, *, enabled=True):
    """Pallas implementation of ActivationModuleWrapper.forward with wrapped nn.ReLU.

    x:    (N, C, H, W) float32 activations (any shape works; treated as flat)
    step: scalar float32 LSQ step size (already initialized)
    """
    if not enabled:
        # __enabled__() False -> just the wrapped module.
        return jnp.maximum(x, 0.0)

    orig_shape = x.shape
    total = int(x.size)
    itemsize = jnp.dtype(x.dtype).itemsize
    flat = x.reshape(-1)

    # Lane-dense 2-D slab; prefer the no-pad layout.
    lanes = _choose_lanes(total)
    pad = (-total) % lanes
    if pad:
        # Rare path (total % 128 != 0). Pad with zeros: relu/fake-quant of 0 is 0.
        flat = jnp.pad(flat, (0, pad))
    rows = (total + pad) // lanes
    x2d = flat.reshape(rows, lanes)

    # ~4 MiB input blocks, rows multiple of 8; ragged final block is masked by Pallas.
    max_block_rows = max(8, (_TARGET_BLOCK_BYTES // (lanes * itemsize)) // 8 * 8)
    if rows <= max_block_rows:
        block_rows = rows            # equals full array dim -> always a legal block
    else:
        block_rows = max_block_rows  # multiple of 8; last block may be ragged
    grid = (pl.cdiv(rows, block_rows),)

    # Exact wrapper-computed reciprocal (bit-stable), guarded against step == 0.
    step_f = jnp.asarray(step, jnp.float32)
    inv_step = jnp.where(step_f != 0.0, 1.0 / step_f, 0.0)
    scalars = jnp.stack([inv_step, step_f])   # (2,) f32, scalar-prefetched into SMEM

    out2d = pl.pallas_call(
        _relu_lsq_kernel,
        out_shape=jax.ShapeDtypeStruct((rows, lanes), x2d.dtype),
        grid_spec=pltpu.PrefetchScalarGridSpec(
            num_scalar_prefetch=1,
            grid=grid,
            in_specs=[pl.BlockSpec((block_rows, lanes), lambda i, s: (i, 0))],
            out_specs=pl.BlockSpec((block_rows, lanes), lambda i, s: (i, 0)),
        ),
        # TODO(synk): on v7x, verify both TensorCores stream (try pltpu.CORE_PARALLEL
        # or an explicit core_map) — "parallel" alone may leave HBM BW on the table.
        compiler_params=pltpu.CompilerParams(
            dimension_semantics=("parallel",),
            vmem_limit_bytes=_VMEM_LIMIT_BYTES,
        ),
    )(scalars, x2d)

    out_flat = out2d.reshape(-1)
    if pad:
        out_flat = out_flat[:total]
    return out_flat.reshape(orig_shape)


def init_lsq_step(x):
    """Deterministic LSQ step-size init from the first activation tensor
    (mirrors LearnedStepSizeQuantization lazy init on first forward)."""
    y = jnp.maximum(x, 0.0)
    return 2.0 * jnp.mean(jnp.abs(y)) / jnp.sqrt(QMAX)


# TODO(synk): the `truck_stats` branch (per-channel moments pushed into a StatsTrucker
# singleton) is a host-side logging side effect and is not implemented.
# TODO(synk): forward-only; QAT training needs a custom_vjp (STE + LSQ step grad).
# TODO(synk): for best end-to-end perf, fuse this ReLU+fake-quant as an epilogue of the
# producing matmul/conv kernel to remove one full HBM round trip of the activations.


def _reference(x, step):
    step = jnp.asarray(step, jnp.float32)
    inv_step = jnp.where(step != 0.0, 1.0 / step, 0.0)
    y = jnp.maximum(x, 0.0)
    q = jnp.clip(jnp.round(y * inv_step), 0.0, QMAX)
    return jnp.where(step != 0.0, q * step, y)


if __name__ == "__main__":
    key = jax.random.PRNGKey(0)
    x = jax.random.normal(key, (2, 4, 16, 16), dtype=jnp.float32)  # NCHW

    step = init_lsq_step(x)                      # deterministic "learned" parameter init
    out = activation_module_wrapper_forward(x, step, enabled=True)
    out = jax.block_until_ready(out)

    ref = _reference(x, step)
    assert out.shape == x.shape
    assert jnp.allclose(out, ref, atol=1e-6), "mismatch vs reference"

    # disabled path (bits_out None / active False) -> plain relu
    out_dis = jax.block_until_ready(
        activation_module_wrapper_forward(x, step, enabled=False))
    assert jnp.allclose(out_dis, jnp.maximum(x, 0.0)), "disabled path mismatch"

    print("KERNEL_OK")
</pallas_src>

<mosaic_0001>
module attributes {stable_mosaic.version = 11 : i64} {
  func.func @_relu_lsq_kernel(%arg0: i32, %arg1: memref<2xf32, #tpu.memory_space<smem>>, %arg2: memref<2x1024xf32, #tpu.memory_space<vmem>>, %arg3: memref<2x1024xf32, #tpu.memory_space<vmem>>) attributes {dimension_semantics = [#tpu.dimension_semantics<parallel>], iteration_bounds = array<i64: 1>, scalar_prefetch = 1 : i64, scratch_operands = 0 : i64, tpu.core_type = #tpu.core_type<tc>, window_params = [{transform_indices = @transform_0, window_bounds = array<i64: 2, 1024>}, {transform_indices = @transform_1, window_bounds = array<i64: 2, 1024>}]} {
    %c0 = arith.constant 0 : index
    %0 = memref.load %arg1[%c0] : memref<2xf32, #tpu.memory_space<smem>>
    %c1 = arith.constant 1 : index
    %1 = memref.load %arg1[%c1] : memref<2xf32, #tpu.memory_space<smem>>
    %c0_0 = arith.constant 0 : index
    %c0_1 = arith.constant 0 : index
    %2 = vector.load %arg2[%c0_0, %c0_1] : memref<2x1024xf32, #tpu.memory_space<vmem>>, vector<2x1024xf32>
    %cst = arith.constant 0.000000e+00 : f32
    %3 = vector.broadcast %cst : f32 to vector<2x1024xf32>
    %4 = arith.maximumf %2, %3 : vector<2x1024xf32>
    %5 = vector.broadcast %0 : f32 to vector<2x1024xf32>
    %6 = arith.mulf %4, %5 : vector<2x1024xf32>
    %7 = math.roundeven %6 : vector<2x1024xf32>
    %cst_2 = arith.constant 0.000000e+00 : f32
    %cst_3 = arith.constant 1.500000e+01 : f32
    %8 = vector.broadcast %cst_2 : f32 to vector<2x1024xf32>
    %9 = arith.maximumf %8, %7 : vector<2x1024xf32>
    %10 = vector.broadcast %cst_3 : f32 to vector<2x1024xf32>
    %11 = arith.minimumf %10, %9 : vector<2x1024xf32>
    %12 = vector.broadcast %1 : f32 to vector<2x1024xf32>
    %13 = arith.mulf %11, %12 : vector<2x1024xf32>
    %cst_4 = arith.constant 0.000000e+00 : f32
    %14 = arith.cmpf one, %1, %cst_4 : f32
    %15 = arith.select %14, %13, %4 : vector<2x1024xf32>
    %c0_5 = arith.constant 0 : index
    %c0_6 = arith.constant 0 : index
    %16 = vector.load %arg3[%c0_5, %c0_6] : memref<2x1024xf32, #tpu.memory_space<vmem>>, vector<2x1024xf32>
    tpu.vector_store %arg3[%c0_5, %c0_6], %15 {strides = array<i32>} : memref<2x1024xf32, #tpu.memory_space<vmem>>, vector<2x1024xf32>,
    return
  }
  func.func @transform_0(%arg0: i32, %arg1: memref<2xf32, #tpu.memory_space<smem>>) -> (i32, i32) {
    %c0_i32 = arith.constant 0 : i32
    %c0_i32_0 = arith.constant 0 : i32
    return %arg0, %c0_i32 : i32, i32
  }
  func.func @transform_1(%arg0: i32, %arg1: memref<2xf32, #tpu.memory_space<smem>>) -> (i32, i32) {
    %c0_i32 = arith.constant 0 : i32
    %c0_i32_0 = arith.constant 0 : i32
    return %arg0, %c0_i32 : i32, i32
  }
}

</mosaic_0001>

<bundles_post_ra>
// kernel: tpu_custom_call.1
= control target key start
LH: loop header
LB: loop body
LE: loop exit
PB: predicated region body
PF: predicated region fallthrough
CT: control target
= control target key end

     0   :  { %s187_s0 = inlined_call_operand.hbm [shape: f32[2], index: 0, kind: input, shape index: {}]   ;;  %s188_s1 = inlined_call_operand.hbm [shape: f32[2,1024], index: 1, kind: input, shape index: {}]   ;;  %s189_s2 = inlined_call_operand.hbm [shape: f32[2,1024], index: 2, kind: output, shape index: {}]  }
   0x1   :  { %s73_s11 = scalar_lea.hbm %s187_s0, 16 }
   0x2   :  { %p74_p0 = scmp.ne.s32.totalorder %s187_s0, %s73_s11  ;;  %p77_p1 = scmp.lt.u32.totalorder %s73_s11, %s187_s0 }
   0x4   :  { %p79_p2 = pnand %p77_p1, %p74_p0 }
   0x6   :  { %82 = shalt.err (!%p79_p2)  }
   0x7   :  { %s133_s16 = smov [#allocation3]  }
   0x8   :  { %8 = dma.hbm_to_smem %s187_s0, 16, %s133_s16, [#allocation2] }
   0x9   :  { %127 = dma.done.wait [#allocation2], 16 }
   0xa   :  { %128 = vsyncadd [#allocation2], 4294967280 }
   0xb   :  { %10 = sfence }
   0xc   :  { %11 = vsyncpa [#allocation5], 0 }
   0xd   :  { %12 = vsyncpa [#allocation6], 0  ;;  %s134_s19 = smov [#allocation4]   ;;  %s83_s23 = scalar_lea.hbm %s188_s1, 256 }
   0xe   :  { %s19_s20 = sshll.u32 %s134_s19, 4  ;;  %p84_p3 = scmp.ne.s32.totalorder %s188_s1, %s83_s23  ;;  %s20_s20 = int_to_ptr.vmem [resolvable:$true] %s19_s20 }
   0xf   :  { %p87_p4 = scmp.lt.u32.totalorder %s83_s23, %s188_s1 }
  0x11   :  { %p89_p5 = pnand %p87_p4, %p84_p3 }
  0x13   :  { %92 = shalt.err (!%p89_p5)
}
  0x14   :  { %s93_s0 = scalar_lea.vmem %s20_s20, 256  ;;  %p98_p7 = scmp.lt.s32.totalorder %s20_s20, %s20_s20 }
  0x15   :  { %p94_p6 = scmp.ne.s32.totalorder %s20_s20, %s93_s0  ;;  %p99_p8 = scmp.lt.s32.totalorder %s93_s0, %s93_s0 }
  0x17   :  { %p100_p9 = por %p99_p8, %p98_p7 }
  0x19   :  { %p101_p10 = pnand %p100_p9, %p94_p6 }
  0x1b   :  { %104 = shalt.err (!%p101_p10)
}
  0x1c   :  { %22 = dma.hbm_to_vmem [thread:$0]  %s188_s1, 256, %s20_s20, [#allocation5]  }
  0x1d   :  { %129 = dma.done.wait [#allocation5], 256  }
  0x1e   :  { %130 = vsyncadd [#allocation5], 4294967040  ;;  %s26_s30 = sld [smem:[#allocation3]]  ;;  %s67_s3 = sld [smem:[#allocation3 + $0x1]]  ;;  %v28_v0 = vld [vmem:[#allocation4] sm:$0xff]  ;;  %v29_v2 = vld [vmem:[#allocation4 + $0x8] sm:$0xff] }
  0x1f   :  { %v30_v3 = vmax.f32 %v28_v0, 0.0  ;;  %v31_v4 = vmax.f32 %v29_v2, 0.0  ;;  %s135_s1 = smov [#allocation7]  }
  0x20   :  { %s58_s5 = sshll.u32 %s135_s1, 4  ;;  %s59_s5 = int_to_ptr.vmem [resolvable:$true] %s58_s5 }
  0x21   :  { %s105_s6 = scalar_lea.vmem %s59_s5, 256  ;;  %p110_p13 = scmp.lt.s32.totalorder %s59_s5, %s59_s5 }
  0x22   :  { %p106_p12 = scmp.ne.s32.totalorder %s59_s5, %s105_s6  ;;  %p111_p0 = scmp.lt.s32.totalorder %s105_s6, %s105_s6 }
  0x24   :  { %v32_v1 = vstv %s26_s30  ;;  %p44_p11 = scmp.ne.f32.partialorder %s67_s3, 0.0  ;;  %v41_v12 = vstv %s67_s3  ;;  %p112_p1 = por %p111_p0, %p110_p13 }
  0x25   :  { %v33_v5 = vmul.f32 %v32_v1, %v30_v3  ;;  %v34_v6 = vmul.f32 %v32_v1, %v31_v4 }
  0x26   :  { %s45_s4 = scalar_select %p44_p11, 1, 0 }
  0x27   :  { %v68_v7 = vround.rtne.f32 %v33_v5  ;;  %v69_v8 = vround.rtne.f32 %v34_v6  ;;  %p113_p2 = pnand %p112_p1, %p106_p12 }
  0x28   :  { %v46_v10 = vstv %s45_s4 }
  0x29   :  { %v37_v9 = vmax.f32 %v68_v7, 0.0  ;;  %v38_v11 = vmax.f32 %v69_v8, 0.0  ;;  %vm47_vm0 = vcmp.eq.s32.totalorder %v46_v10, 1 }
  0x2b   :  { %v39_v13 = vmin.f32 %v37_v9, 15.0  ;;  %v40_v14 = vmin.f32 %v38_v11, 15.0 }
  0x2d   :  { %v42_v15 = vmul.f32 %v41_v12, %v39_v13  ;;  %v43_v16 = vmul.f32 %v41_v12, %v40_v14 }
  0x2f   :  { %v48_v17 = vsel %vm47_vm0, %v42_v15, %v30_v3  ;;  %v49_v18 = vsel %vm47_vm0, %v43_v16, %v31_v4 }
  0x30   :  { %50 = vst [vmem:[#allocation7] sm:$0xff] %v48_v17  ;;  %51 = vst [vmem:[#allocation7 + $0x8] sm:$0xff] %v49_v18 }
  0x31   :  { %116 = shalt.err (!%p113_p2)
}
  0x32   :  { %s117_s9 = scalar_lea.hbm %s189_s2, 256 }
  0x33   :  { %p118_p3 = scmp.ne.s32.totalorder %s189_s2, %s117_s9  ;;  %p121_p4 = scmp.lt.u32.totalorder %s117_s9, %s189_s2 }
  0x35   :  { %p123_p5 = pnand %p121_p4, %p118_p3 }
  0x37   :  { %126 = shalt.err (!%p123_p5)
}
  0x38   :  { %61 = dma.vmem_to_hbm [thread:$0]  %s59_s5, 256, %s189_s2, [#allocation6]  }
  0x39   :  { %131 = dma.done.wait [#allocation6], 256  }
  0x3a   :  { %132 = vsyncadd [#allocation6], 4294967040 }
  0x3b   :  { %65 = vsyncpa [#allocation5], 1 }
  0x3c   :  { %66 = vsyncpa [#allocation6], 1 }

</bundles_post_ra>
